<compile_context>
chip_gen: v7x
topology: tpu7x:2x2x1
jax: 0.10.0
libtpu: 0.0.40
codegen_flags: <defaults>
</compile_context>

<pallas_src>
import functools
import math

import jax
import jax.numpy as jnp
from jax import lax
from jax.experimental import pallas as pl
from jax.experimental.pallas import tpu as pltpu


_NEG_BIG = float(jnp.finfo(jnp.float32).min)   # finite "-inf" (avoids inf-inf)
_TARGET_TILE_BYTES = 4 * 1024 * 1024           # ~4 MiB logits tile per buffer
_MAX_BLOCK_ROWS = 4096
_MAX_BLOCK_CLASSES = 4096                      # lanes; multiple of 128


def _round_up(n, m):
    return ((n + m - 1) // m) * m


def _round_down(n, m):
    return (n // m) * m


# ---------------------------------------------------------------------------
# Kernel A: class axis fits in one lane-block (no scratch, single pass).
#   x: [bR, C] (C on lanes), tgt: [bR, 1], loss: [bR, 1]
# ---------------------------------------------------------------------------
def _ce_kernel_single(x_ref, tgt_ref, loss_ref, *, ignore_index):
    x = x_ref[...].astype(jnp.float32)
    tgt = tgt_ref[...]
    m = jnp.max(x, axis=1, keepdims=True)
    lse = jnp.log(jnp.sum(jnp.exp(x - m), axis=1, keepdims=True)) + m
    col = lax.broadcasted_iota(jnp.int32, x.shape, 1)
    picked = jnp.sum(jnp.where(col == tgt, x, 0.0), axis=1, keepdims=True)
    loss_ref[...] = jnp.where(tgt != ignore_index, lse - picked, 0.0)


# ---------------------------------------------------------------------------
# Kernel B: online (flash-style) LSE over a tiled class axis (grid axis 1).
#   scratch: running max / running sum / picked logit, all [bR, 1] f32.
# ---------------------------------------------------------------------------
def _ce_kernel_online(x_ref, tgt_ref, loss_ref, m_sc, l_sc, p_sc, *,
                      num_classes, block_classes, ignore_index):
    k = pl.program_id(1)

    @pl.when(k == 0)
    def _():
        m_sc[...] = jnp.full_like(m_sc, _NEG_BIG)
        l_sc[...] = jnp.zeros_like(l_sc)
        p_sc[...] = jnp.zeros_like(p_sc)

    x = x_ref[...].astype(jnp.float32)                  # [bR, bC]
    tgt = tgt_ref[...]                                  # [bR, 1]
    col = k * block_classes + lax.broadcasted_iota(jnp.int32, x.shape, 1)
    valid = col < num_classes                           # mask ragged last C tile
    x = jnp.where(valid, x, _NEG_BIG)

    tile_max = jnp.max(x, axis=1, keepdims=True)
    m_new = jnp.maximum(m_sc[...], tile_max)
    scale = jnp.exp(m_sc[...] - m_new)
    l_sc[...] = l_sc[...] * scale + jnp.sum(
        jnp.where(valid, jnp.exp(x - m_new), 0.0), axis=1, keepdims=True)
    p_sc[...] = p_sc[...] + jnp.sum(
        jnp.where(col == tgt, x, 0.0), axis=1, keepdims=True)
    m_sc[...] = m_new

    @pl.when(k == pl.num_programs(1) - 1)
    def _():
        loss = m_sc[...] + jnp.log(l_sc[...]) - p_sc[...]
        loss_ref[...] = jnp.where(tgt != ignore_index, loss, 0.0)


# ---------------------------------------------------------------------------
# Kernel C: channel-second (dense-prediction) layout, no HBM transpose.
#   x: [1, C, bS] (C on sublanes, spatial on lanes), tgt/loss: [1, bS]
#   Output and targets are naturally lane-dense here.
# ---------------------------------------------------------------------------
def _ce_kernel_spatial(x_ref, tgt_ref, loss_ref, *, ignore_index):
    x = x_ref[0].astype(jnp.float32)                    # [C, bS]
    tgt = tgt_ref[...]                                  # [1, bS]
    m = jnp.max(x, axis=0, keepdims=True)
    lse = jnp.log(jnp.sum(jnp.exp(x - m), axis=0, keepdims=True)) + m
    row = lax.broadcasted_iota(jnp.int32, x.shape, 0)
    picked = jnp.sum(jnp.where(row == tgt, x, 0.0), axis=0, keepdims=True)
    loss_ref[...] = jnp.where(tgt != ignore_index, lse - picked, 0.0)


# ---------------------------------------------------------------------------
# wrappers
# ---------------------------------------------------------------------------
def _ce_flat(x, tgt, ignore_index, block_rows=None, block_classes=None):
    """x: [N, C] (class axis on lanes), tgt: [N] -> loss [N]."""
    n, C = x.shape
    isz = x.dtype.itemsize

    # --- class tiling ---
    if block_classes is None:
        bC = C if C <= _MAX_BLOCK_CLASSES else _MAX_BLOCK_CLASSES
    else:
        bC = min(int(block_classes), C)
    if bC < C:
        bC = _round_up(bC, 128)          # tiled class axis must be 128-aligned
    c_blocks = pl.cdiv(C, bC)

    # --- row tiling: target ~4 MiB logits tile per buffer, VMEM-safe ---
    lanes = _round_up(min(bC, C), 128)   # lanes actually occupied in VMEM
    if block_rows is None:
        bR = _TARGET_TILE_BYTES // max(lanes * isz, 1)
        bR = max(8, min(_round_down(bR, 8), _MAX_BLOCK_ROWS))
    else:
        bR = max(8, _round_up(int(block_rows), 8))
    bR = min(bR, _round_up(n, 8))
    r_blocks = pl.cdiv(n, bR)

    tgt2 = tgt.reshape(n, 1).astype(jnp.int32)

    # VMEM usage estimate (double-buffered logits + lane-sparse row vectors).
    x_buf = bR * lanes * isz
    row_buf = bR * 512                            # (bR, 1) 32-bit buffer
    n_scratch = 0 if c_blocks == 1 else 3
    est = 2 * x_buf + (4 + n_scratch) * row_buf
    vmem_limit = int(min(max(2 * est, 16 * 2**20), 32 * 2**20))

    cost = pl.CostEstimate(flops=6 * n * C, transcendentals=n * C,
                           bytes_accessed=n * C * isz + 2 * n * 4)

    if c_blocks == 1:
        kernel = functools.partial(_ce_kernel_single,
                                   ignore_index=int(ignore_index))
        grid_spec = pltpu.PrefetchScalarGridSpec(
            num_scalar_prefetch=0,
            grid=(r_blocks,),
            in_specs=[pl.BlockSpec((bR, C), lambda i: (i, 0)),
                      pl.BlockSpec((bR, 1), lambda i: (i, 0))],
            out_specs=pl.BlockSpec((bR, 1), lambda i: (i, 0)))
        dims = ("parallel",)
    else:
        kernel = functools.partial(_ce_kernel_online, num_classes=C,
                                   block_classes=bC,
                                   ignore_index=int(ignore_index))
        grid_spec = pltpu.PrefetchScalarGridSpec(
            num_scalar_prefetch=0,
            grid=(r_blocks, c_blocks),
            in_specs=[pl.BlockSpec((bR, bC), lambda i, k: (i, k)),
                      pl.BlockSpec((bR, 1), lambda i, k: (i, 0))],
            out_specs=pl.BlockSpec((bR, 1), lambda i, k: (i, 0)),
            scratch_shapes=[pltpu.VMEM((bR, 1), jnp.float32)] * 3)
        dims = ("parallel", "arbitrary")

    loss = pl.pallas_call(
        kernel,
        out_shape=jax.ShapeDtypeStruct((n, 1), jnp.float32),
        grid_spec=grid_spec,
        compiler_params=pltpu.CompilerParams(
            dimension_semantics=dims, vmem_limit_bytes=vmem_limit),
        cost_estimate=cost,
    )(x, tgt2)
    # TODO(synk): output stays (n, 1) column (lane-sparse store); a lane-dense
    # packed output would need an in-kernel sublane->lane transpose.
    return loss[:, 0]


def _ce_spatial(x3, tgt2, ignore_index):
    """x3: [N, C, S] channel-second, tgt2: [N, S] -> loss [N, S]."""
    N, C, S = x3.shape
    isz = x3.dtype.itemsize

    if S <= 128:
        bS = S
    else:
        bS = _TARGET_TILE_BYTES // max(_round_up(C, 8) * isz, 1)
        bS = max(128, _round_down(bS, 128))
        bS = min(bS, _round_up(S, 128))
    s_blocks = pl.cdiv(S, bS)

    lanes = _round_up(bS, 128)
    x_buf = _round_up(C, 8) * lanes * isz
    est = 2 * x_buf + 4 * lanes * 32
    vmem_limit = int(min(max(2 * est, 16 * 2**20), 32 * 2**20))

    cost = pl.CostEstimate(flops=6 * N * C * S, transcendentals=N * C * S,
                           bytes_accessed=N * C * S * isz + 2 * N * S * 4)

    kernel = functools.partial(_ce_kernel_spatial,
                               ignore_index=int(ignore_index))
    return pl.pallas_call(
        kernel,
        out_shape=jax.ShapeDtypeStruct((N, S), jnp.float32),
        grid_spec=pltpu.PrefetchScalarGridSpec(
            num_scalar_prefetch=0,
            grid=(N, s_blocks),
            in_specs=[pl.BlockSpec((1, C, bS), lambda b, s: (b, 0, s)),
                      pl.BlockSpec((1, bS), lambda b, s: (b, s))],
            out_specs=pl.BlockSpec((1, bS), lambda b, s: (b, s))),
        compiler_params=pltpu.CompilerParams(
            dimension_semantics=("parallel", "parallel"),
            vmem_limit_bytes=vmem_limit),
        cost_estimate=cost,
    )(x3, tgt2)


def ce_loss(out, gt_index, ignore_index=-100, *,
            block_rows=None, block_classes=None):
    """Equivalent of nn.CrossEntropyLoss(reduction='none')(out, gt_index).

    out:      [N, C] or [N, C, d1, d2, ...] logits (any float dtype)
    gt_index: [N]    or [N, d1, d2, ...]    integer class indices
    returns:  [N]    or [N, d1, d2, ...]    per-element loss (float32)
    """
    C = out.shape[1]
    if out.ndim == 2:
        return _ce_flat(out, gt_index, ignore_index, block_rows, block_classes)

    spatial = out.shape[2:]
    N = out.shape[0]
    S = int(math.prod(spatial))

    # Channel-second layout handled in-kernel (C on sublanes, spatial on
    # lanes): no HBM transpose/moveaxis of the logits is needed.
    if _round_up(C, 8) * 128 * out.dtype.itemsize <= 2 * _TARGET_TILE_BYTES:
        x3 = out.reshape(N, C, S)                    # free: merges trailing dims
        tgt2 = gt_index.reshape(N, S).astype(jnp.int32)
        loss = _ce_spatial(x3, tgt2, ignore_index)
        return loss.reshape((N,) + spatial)

    # Fallback for huge class counts with spatial dims: transpose to
    # class-last (one HBM copy of the logits) and use the online-LSE kernel.
    # TODO(synk): a C-tiled sublane-path kernel would avoid this copy too.
    x = jnp.moveaxis(out, 1, -1).reshape(-1, C)
    loss = _ce_flat(x, gt_index.reshape(-1), ignore_index,
                    block_rows, block_classes)
    return loss.reshape((N,) + spatial)


# TODO(synk): torch>=1.10 CrossEntropyLoss also accepts soft (probability)
# targets; `gt_index` in the reference module implies integer class indices,
# so only the index form (incl. ignore_index) is implemented.  Out-of-range
# targets (other than ignore_index) yield loss = logsumexp instead of raising.


# ---------------------------------------------------------------------------
if __name__ == "__main__":
    key = jax.random.PRNGKey(0)
    ks = jax.random.split(key, 8)

    def ref_ce(out, gt, ignore_index=-100):
        Cc = out.shape[1]
        logp = jax.nn.log_softmax(out.astype(jnp.float32), axis=1)
        safe = jnp.clip(gt, 0, Cc - 1)
        picked = jnp.take_along_axis(logp, jnp.expand_dims(safe, 1), axis=1)
        loss = -jnp.squeeze(picked, 1)
        return jnp.where(gt == ignore_index, 0.0, loss)

    # case 1: plain classification logits [N, C], targets [N] (with one ignored)
    N, C = 8, 32
    logits = jax.random.normal(ks[0], (N, C), jnp.float32)
    gt = jax.random.randint(ks[1], (N,), 0, C, jnp.int32).at[3].set(-100)
    got = jax.block_until_ready(jax.jit(ce_loss)(logits, gt))
    assert got.shape == (N,)
    assert jnp.allclose(got, ref_ce(logits, gt), atol=1e-4, rtol=1e-5)

    # case 2: ragged row count + class count not a multiple of 128
    N2, C2 = 13, 100
    logits2 = jax.random.normal(ks[2], (N2, C2), jnp.float32)
    gt2 = jax.random.randint(ks[3], (N2,), 0, C2, jnp.int32)
    got2 = jax.block_until_ready(jax.jit(ce_loss)(logits2, gt2))
    assert jnp.allclose(got2, ref_ce(logits2, gt2), atol=1e-4, rtol=1e-5)

    # case 3: forced class tiling -> exercises the online-LSE multi-block path
    N3, C3 = 16, 300
    logits3 = jax.random.normal(ks[4], (N3, C3), jnp.float32)
    gt3 = jax.random.randint(ks[5], (N3,), 0, C3, jnp.int32)
    got3 = jax.block_until_ready(
        ce_loss(logits3, gt3, block_rows=8, block_classes=128))
    assert jnp.allclose(got3, ref_ce(logits3, gt3), atol=1e-4, rtol=1e-5)

    # case 4: dense-prediction logits [N, C, H, W], targets [N, H, W]
    B4, C4, H, W = 2, 16, 4, 4
    logits4 = jax.random.normal(ks[6], (B4, C4, H, W), jnp.float32)
    gt4 = jax.random.randint(ks[7], (B4, H, W), 0, C4, jnp.int32)
    got4 = jax.block_until_ready(jax.jit(ce_loss)(logits4, gt4))
    ref4 = -jnp.take_along_axis(jax.nn.log_softmax(logits4, axis=1),
                                gt4[:, None], axis=1)[:, 0]
    assert got4.shape == (B4, H, W)
    assert jnp.allclose(got4, ref4, atol=1e-4, rtol=1e-5)

    print("KERNEL_OK")
</pallas_src>

<mosaic_0001>
module attributes {stable_mosaic.version = 11 : i64} {
  func.func @_ce_kernel_single(%arg0: i32, %arg1: memref<8x32xf32, #tpu.memory_space<vmem>>, %arg2: memref<8x1xi32, #tpu.memory_space<vmem>>, %arg3: memref<8x1xf32, #tpu.memory_space<vmem>>) attributes {dimension_semantics = [#tpu.dimension_semantics<parallel>], iteration_bounds = array<i64: 1>, scalar_prefetch = 0 : i64, scratch_operands = 0 : i64, tpu.core_type = #tpu.core_type<tc>, window_params = [{transform_indices = @transform_0, window_bounds = array<i64: 8, 32>}, {transform_indices = @transform_1, window_bounds = array<i64: 8, 1>}, {transform_indices = @transform_2, window_bounds = array<i64: 8, 1>}]} {
    %c0 = arith.constant 0 : index
    %c0_0 = arith.constant 0 : index
    %0 = vector.load %arg1[%c0, %c0_0] : memref<8x32xf32, #tpu.memory_space<vmem>>, vector<8x32xf32>
    %c0_1 = arith.constant 0 : index
    %c0_2 = arith.constant 0 : index
    %1 = vector.load %arg2[%c0_1, %c0_2] : memref<8x1xi32, #tpu.memory_space<vmem>>, vector<8x1xi32>
    %cst = arith.constant dense<0xFF800000> : vector<8xf32>
    %2 = vector.multi_reduction <maximumf>, %0, %cst [1] : vector<8x32xf32> to vector<8xf32>
    %3 = vector.shape_cast %2 : vector<8xf32> to vector<8x1xf32>
    %4 = vector.broadcast %3 : vector<8x1xf32> to vector<8x32xf32>
    %5 = arith.subf %0, %4 : vector<8x32xf32>
    %6 = math.exp %5 : vector<8x32xf32>
    %cst_3 = arith.constant dense<0.000000e+00> : vector<8xf32>
    %7 = vector.multi_reduction <add>, %6, %cst_3 [1] : vector<8x32xf32> to vector<8xf32>
    %8 = vector.shape_cast %7 : vector<8xf32> to vector<8x1xf32>
    %9 = math.log %8 : vector<8x1xf32>
    %10 = arith.addf %9, %3 : vector<8x1xf32>
    %11 = tpu.iota {dimensions = array<i32: 1>} : vector<8x32xi32>
    %12 = vector.broadcast %1 : vector<8x1xi32> to vector<8x32xi32>
    %13 = arith.cmpi eq, %11, %12 : vector<8x32xi32>
    %cst_4 = arith.constant 0.000000e+00 : f32
    %14 = vector.broadcast %cst_4 : f32 to vector<8x32xf32>
    %15 = arith.select %13, %0, %14 : vector<8x32xi1>, vector<8x32xf32>
    %cst_5 = arith.constant dense<0.000000e+00> : vector<8xf32>
    %16 = vector.multi_reduction <add>, %15, %cst_5 [1] : vector<8x32xf32> to vector<8xf32>
    %17 = vector.shape_cast %16 : vector<8xf32> to vector<8x1xf32>
    %c-100_i32 = arith.constant -100 : i32
    %18 = vector.broadcast %c-100_i32 : i32 to vector<8x1xi32>
    %19 = arith.cmpi ne, %1, %18 : vector<8x1xi32>
    %20 = arith.subf %10, %17 : vector<8x1xf32>
    %cst_6 = arith.constant 0.000000e+00 : f32
    %21 = vector.broadcast %cst_6 : f32 to vector<8x1xf32>
    %22 = arith.select %19, %20, %21 : vector<8x1xi1>, vector<8x1xf32>
    %c0_7 = arith.constant 0 : index
    %c0_8 = arith.constant 0 : index
    %23 = vector.load %arg3[%c0_7, %c0_8] : memref<8x1xf32, #tpu.memory_space<vmem>>, vector<8x1xf32>
    tpu.vector_store %arg3[%c0_7, %c0_8], %22 {strides = array<i32>} : memref<8x1xf32, #tpu.memory_space<vmem>>, vector<8x1xf32>,
    return
  }
  func.func @transform_0(%arg0: i32) -> (i32, i32) {
    %c0_i32 = arith.constant 0 : i32
    %c0_i32_0 = arith.constant 0 : i32
    return %arg0, %c0_i32 : i32, i32
  }
  func.func @transform_1(%arg0: i32) -> (i32, i32) {
    %c0_i32 = arith.constant 0 : i32
    %c0_i32_0 = arith.constant 0 : i32
    return %arg0, %c0_i32 : i32, i32
  }
  func.func @transform_2(%arg0: i32) -> (i32, i32) {
    %c0_i32 = arith.constant 0 : i32
    %c0_i32_0 = arith.constant 0 : i32
    return %arg0, %c0_i32 : i32, i32
  }
}

</mosaic_0001>

<bundles_post_ra>
// kernel: ce_loss.1
= control target key start
LH: loop header
LB: loop body
LE: loop exit
PB: predicated region body
PF: predicated region fallthrough
CT: control target
= control target key end

     0   :  { %vm13_vm0 = vcmask 261120   ;;  %v51_v1 = vmov 0   ;;  %v26_v7 = vlaneseq  ;;  %vm39_vm3 = vcmask 7168   ;;  %s79_s0 = inlined_call_operand.vmem [shape: f32[8,32], index: 0, kind: input, shape index: {}]   ;;  %s80_s1 = inlined_call_operand.vmem [shape: s32[8,1], index: 1, kind: input, shape index: {}]   ;;  %s81_s2 = inlined_call_operand.vmem [shape: f32[8,1], index: 2, kind: output, shape index: {}]  }
   0x1   :  { %v11_v0 = vld [vmem:[%s79_s0] sm:$0xff]  ;;  %46 = vset.pattern.permute.xlu0 %v51_v1 }
   0x2   :  { %v14_v2 = vsel %vm13_vm0, %v11_v0, -inf  ;;  %v12_v3 = vld [vmem:[%s80_s1] sm:$0xff]  ;;  %v27_v8 = vand.u32 127, %v26_v7 }
   0x3   :  { %15 = vmax.xlane.f32.xlu0 %v14_v2  ;;  %vm36_vm2 = vcmp.ne.s32.totalorder %v12_v3, 4294967196 }
  0x19   :  { %29 = vperm.xlu0 %46, %v12_v3  }
  0x90   :  { %v16_v4 = vpop.xlane.xlu0 %15 }
  0x91   :  { %v17_v5 = vsub.f32 %v11_v0, %v16_v4 }
  0x93   :  { %v18_v6 = vmul.f32 1.442695, %v17_v5 }
  0x95   :  { %47 = vpow2.f32 %v18_v6 }
  0x98   :  { %v30_v9 = vpop.permute.xlu0 %29 }
  0x99   :  { %vm31_vm1 = vcmp.eq.s32.totalorder %v27_v8, %v30_v9 }
  0x9a   :  { %v32_v11 = vsel %vm31_vm1, %v11_v0, 0.0 }
  0x9b   :  { %v33_v13 = vsel %vm13_vm0, %v32_v11, 0.0 }
  0x9f   :  { %v48_v10 = vpop.eup %47 }
  0xa0   :  { %v20_v12 = vsel %vm13_vm0, %v48_v10, 0.0 }
  0xa1   :  { %21 = vadd.xlane.f32.xlu1 %v20_v12 }
  0xa5   :  { %34 = vadd.xlane.f32.xlu1 %v33_v13 }
 0x12e   :  { %v22_v14 = vpop.xlane.xlu1 %21 }
 0x12f   :  { %49 = vlog2.f32 %v22_v14 }
 0x132   :  { %v35_v17 = vpop.xlane.xlu1 %34 }
 0x139   :  { %v50_v15 = vpop.eup %49 }
 0x13a   :  { %v24_v16 = vmul.f32 0.6931472, %v50_v15 }
 0x13c   :  { %v25_v18 = vadd.f32 %v24_v16, %v16_v4 }
 0x13e   :  { %v37_v19 = vsub.f32 %v25_v18, %v35_v17 }
 0x140   :  { %v38_v20 = vsel %vm36_vm2, %v37_v19, 0.0 }
 0x141   :  { %40 = vst.msk [vmem:[%s81_s2] sm:$0xff] %vm39_vm3, %v38_v20 }

</bundles_post_ra>
